<compile_context>
chip_gen: v7x
topology: tpu7x:2x2x1
jax: 0.10.0
libtpu: 0.0.40
codegen_flags: <defaults>
</compile_context>

<pallas_src>
import functools

import jax
import jax.numpy as jnp
from jax.experimental import pallas as pl
from jax.experimental.pallas import tpu as pltpu

HID1 = 128      # fc1 width
HID2 = 64       # fc2 width
HEAD = 32       # per-stream head-1 width
Q_LANES = 128   # lane-dense output slab width (>= output_size + 2)


def dueling_dqn_kernel(x_ref,
                       w1_ref, b1_ref,
                       w2_ref, b2_ref,
                       wh1_ref, bh1_ref,
                       wh2_ref, bh2_ref,
                       q_ref,
                       *, output_size):
    x = x_ref[...]

    # fc1 + relu
    h1 = jnp.dot(x, w1_ref[...], preferred_element_type=jnp.float32) + b1_ref[...]
    h1 = jnp.maximum(h1, 0.0)

    # fc2 + relu
    h2 = jnp.dot(h1, w2_ref[...], preferred_element_type=jnp.float32) + b2_ref[...]
    h2 = jnp.maximum(h2, 0.0)

    # fused value|advantage head-1 + relu (lanes 0..31 value, 32..63 advantage)
    h3 = jnp.dot(h2, wh1_ref[...], preferred_element_type=jnp.float32) + bh1_ref[...]
    h3 = jnp.maximum(h3, 0.0)

    # fused, lane-dense head-2:
    #   lanes 0..A-1 : advantage, lane A : value, lane A+1 : mean(advantage),
    #   lanes > A+1  : exact zero padding.
    slab = jnp.dot(h3, wh2_ref[...], preferred_element_type=jnp.float32) + bh2_ref[...]

    value = slab[:, output_size:output_size + 1]        # (B, 1)
    adv_mean = slab[:, output_size + 1:output_size + 2]  # (B, 1)

    # q = value + (advantage - mean); lanes >= A are padding, sliced off outside.
    q_ref[...] = slab + value - adv_mean


def init_params(key, input_size, output_size):
    """Deterministic init mimicking PyTorch nn.Linear default U(-1/sqrt(fan_in), +)."""
    def linear(key, fan_in, fan_out):
        kw, kb = jax.random.split(key)
        bound = 1.0 / jnp.sqrt(jnp.float32(fan_in))
        # stored already transposed: (fan_in, fan_out)
        w = jax.random.uniform(kw, (fan_in, fan_out), jnp.float32, -bound, bound)
        b = jax.random.uniform(kb, (1, fan_out), jnp.float32, -bound, bound)
        return w, b

    keys = jax.random.split(key, 6)
    w1, b1 = linear(keys[0], input_size, HID1)
    w2, b2 = linear(keys[1], HID1, HID2)
    wv1, bv1 = linear(keys[2], HID2, HEAD)
    wv2, bv2 = linear(keys[3], HEAD, 1)
    wa1, ba1 = linear(keys[4], HID2, HEAD)
    wa2, ba2 = linear(keys[5], HEAD, output_size)
    return dict(w1=w1, b1=b1, w2=w2, b2=b2,
                wv1=wv1, bv1=bv1, wv2=wv2, bv2=bv2,
                wa1=wa1, ba1=ba1, wa2=wa2, ba2=ba2)


def prepack_params(p, output_size):
    """Pre-pack (once, at param-construction time) the value/advantage heads."""
    A = output_size
    assert A + 2 <= Q_LANES, "output_size too large for a single 128-lane slab"

    # head-1: [wv1 | wa1] -> (64, 64), [bv1 | ba1] -> (1, 64)
    wh1 = jnp.concatenate([p["wv1"], p["wa1"]], axis=1)
    bh1 = jnp.concatenate([p["bv1"], p["ba1"]], axis=1)

    # head-2: block-diagonal, zero-padded to 128 lanes.  Off-diagonal blocks
    # are exact f32 zeros by construction (built from jnp.zeros).
    wh2 = jnp.zeros((HID2, Q_LANES), jnp.float32)
    wh2 = wh2.at[:HEAD, A:A + 1].set(p["wv2"])                      # value column
    wh2 = wh2.at[HEAD:, :A].set(p["wa2"])                           # advantage columns
    wh2 = wh2.at[HEAD:, A + 1:A + 2].set(                           # mean(advantage) column
        p["wa2"] @ jnp.full((A, 1), 1.0 / A, jnp.float32))

    bh2 = jnp.zeros((1, Q_LANES), jnp.float32)
    bh2 = bh2.at[0, :A].set(p["ba2"][0])
    bh2 = bh2.at[0, A].set(p["bv2"][0, 0])
    bh2 = bh2.at[0, A + 1].set(jnp.mean(p["ba2"]))

    return dict(w1=p["w1"], b1=p["b1"], w2=p["w2"], b2=p["b2"],
                wh1=wh1, bh1=bh1, wh2=wh2, bh2=bh2)


def dueling_dqn_forward(x, packed, output_size, *, max_tile_b=256):
    """x: (B, input_size) f32.  packed: output of prepack_params.  Returns (B, A) f32."""
    B, in_size = x.shape

    # Batch tiling: small batches -> one sublane-aligned tile; big batches ->
    # 256-row tiles (fills a 256x256 MXU pass, shards across v7x TCs).
    if B >= max_tile_b:
        tile_b = max_tile_b
    else:
        tile_b = ((B + 7) // 8) * 8
    b_pad = ((B + tile_b - 1) // tile_b) * tile_b
    if b_pad != B:
        x = jnp.pad(x, ((0, b_pad - B), (0, 0)))
    grid = (b_pad // tile_b,)

    operands = (
        x,
        packed["w1"], packed["b1"],
        packed["w2"], packed["b2"],
        packed["wh1"], packed["bh1"],
        packed["wh2"], packed["bh2"],
    )

    def resident_spec(op):  # weights/biases: same full-array block every grid step
        return pl.BlockSpec(op.shape, lambda b: (0, 0))

    in_specs = [pl.BlockSpec((tile_b, in_size), lambda b: (b, 0))]
    in_specs += [resident_spec(op) for op in operands[1:]]
    out_spec = pl.BlockSpec((tile_b, Q_LANES), lambda b: (b, 0))

    # Advisory cost estimate (helps XLA schedule this tiny custom call).
    weight_bytes = sum(int(op.size) * op.dtype.itemsize for op in operands[1:])
    flops = 2 * b_pad * (in_size * HID1 + HID1 * HID2 + HID2 * (2 * HEAD)
                         + (2 * HEAD) * Q_LANES)
    bytes_accessed = int(x.size) * 4 + b_pad * Q_LANES * 4 + weight_bytes

    q_slab = pl.pallas_call(
        functools.partial(dueling_dqn_kernel, output_size=output_size),
        out_shape=jax.ShapeDtypeStruct((b_pad, Q_LANES), jnp.float32),
        grid=grid,
        in_specs=in_specs,
        out_specs=out_spec,
        compiler_params=pltpu.CompilerParams(dimension_semantics=("parallel",)),
        cost_estimate=pl.CostEstimate(flops=flops, transcendentals=0,
                                      bytes_accessed=bytes_accessed),
    )(*operands)

    return q_slab[:B, :output_size]


def reference_forward(x, p):
    """Plain-JAX reference replicating the PyTorch forward exactly (unpacked params)."""
    h1 = jnp.maximum(x @ p["w1"] + p["b1"], 0.0)
    h2 = jnp.maximum(h1 @ p["w2"] + p["b2"], 0.0)
    v = jnp.maximum(h2 @ p["wv1"] + p["bv1"], 0.0) @ p["wv2"] + p["bv2"]
    a = jnp.maximum(h2 @ p["wa1"] + p["ba1"], 0.0) @ p["wa2"] + p["ba2"]
    return v + (a - a.mean(axis=1, keepdims=True))


if __name__ == "__main__":
    batch = 8
    input_size = 16
    output_size = 4

    key = jax.random.PRNGKey(0)
    kx, kp = jax.random.split(key)
    x = jax.random.normal(kx, (batch, input_size), jnp.float32)

    params = init_params(kp, input_size, output_size)
    packed = prepack_params(params, output_size)

    q = dueling_dqn_forward(x, packed, output_size)
    q = jax.block_until_ready(q)

    q_ref = reference_forward(x, params)
    assert q.shape == (batch, output_size)
    assert jnp.allclose(q, q_ref, atol=1e-4, rtol=1e-4), "mismatch vs reference"

    print("KERNEL_OK")
</pallas_src>

<mosaic_0001>
module attributes {stable_mosaic.version = 11 : i64} {
  func.func @dueling_dqn_kernel(%arg0: i32, %arg1: memref<8x16xf32, #tpu.memory_space<vmem>>, %arg2: memref<16x128xf32, #tpu.memory_space<vmem>>, %arg3: memref<1x128xf32, #tpu.memory_space<vmem>>, %arg4: memref<128x64xf32, #tpu.memory_space<vmem>>, %arg5: memref<1x64xf32, #tpu.memory_space<vmem>>, %arg6: memref<64x64xf32, #tpu.memory_space<vmem>>, %arg7: memref<1x64xf32, #tpu.memory_space<vmem>>, %arg8: memref<64x128xf32, #tpu.memory_space<vmem>>, %arg9: memref<1x128xf32, #tpu.memory_space<vmem>>, %arg10: memref<8x128xf32, #tpu.memory_space<vmem>>) attributes {dimension_semantics = [#tpu.dimension_semantics<parallel>], iteration_bounds = array<i64: 1>, scalar_prefetch = 0 : i64, scratch_operands = 0 : i64, tpu.core_type = #tpu.core_type<tc>, window_params = [{transform_indices = @transform_0, window_bounds = array<i64: 8, 16>}, {pipeline_mode = #tpu.pipeline_mode<synchronous>, transform_indices = @transform_1, window_bounds = array<i64: 16, 128>}, {pipeline_mode = #tpu.pipeline_mode<synchronous>, transform_indices = @transform_2, window_bounds = array<i64: 1, 128>}, {pipeline_mode = #tpu.pipeline_mode<synchronous>, transform_indices = @transform_3, window_bounds = array<i64: 128, 64>}, {pipeline_mode = #tpu.pipeline_mode<synchronous>, transform_indices = @transform_4, window_bounds = array<i64: 1, 64>}, {pipeline_mode = #tpu.pipeline_mode<synchronous>, transform_indices = @transform_5, window_bounds = array<i64: 64, 64>}, {pipeline_mode = #tpu.pipeline_mode<synchronous>, transform_indices = @transform_6, window_bounds = array<i64: 1, 64>}, {pipeline_mode = #tpu.pipeline_mode<synchronous>, transform_indices = @transform_7, window_bounds = array<i64: 64, 128>}, {pipeline_mode = #tpu.pipeline_mode<synchronous>, transform_indices = @transform_8, window_bounds = array<i64: 1, 128>}, {transform_indices = @transform_9, window_bounds = array<i64: 8, 128>}]} {
    %c0 = arith.constant 0 : index
    %c0_0 = arith.constant 0 : index
    %0 = vector.load %arg1[%c0, %c0_0] : memref<8x16xf32, #tpu.memory_space<vmem>>, vector<8x16xf32>
    %c0_1 = arith.constant 0 : index
    %c0_2 = arith.constant 0 : index
    %1 = vector.load %arg2[%c0_1, %c0_2] : memref<16x128xf32, #tpu.memory_space<vmem>>, vector<16x128xf32>
    %cst = arith.constant dense<0.000000e+00> : vector<8x128xf32>
    %2 = tpu.matmul %0, %1, %cst {dimension_numbers = #tpu.dot_dimension_numbers<[1], [0], [0], [1], [0, 0, 1, 1], [], []>} : vector<8x16xf32>, vector<16x128xf32>, vector<8x128xf32> -> vector<8x128xf32>
    %c0_3 = arith.constant 0 : index
    %c0_4 = arith.constant 0 : index
    %3 = vector.load %arg3[%c0_3, %c0_4] : memref<1x128xf32, #tpu.memory_space<vmem>>, vector<1x128xf32>
    %4 = vector.broadcast %3 : vector<1x128xf32> to vector<8x128xf32>
    %5 = arith.addf %2, %4 : vector<8x128xf32>
    %cst_5 = arith.constant 0.000000e+00 : f32
    %6 = vector.broadcast %cst_5 : f32 to vector<8x128xf32>
    %7 = arith.maximumf %5, %6 : vector<8x128xf32>
    %c0_6 = arith.constant 0 : index
    %c0_7 = arith.constant 0 : index
    %8 = vector.load %arg4[%c0_6, %c0_7] : memref<128x64xf32, #tpu.memory_space<vmem>>, vector<128x64xf32>
    %cst_8 = arith.constant dense<0.000000e+00> : vector<8x64xf32>
    %9 = tpu.matmul %7, %8, %cst_8 {dimension_numbers = #tpu.dot_dimension_numbers<[1], [0], [0], [1], [0, 0, 1, 1], [], []>} : vector<8x128xf32>, vector<128x64xf32>, vector<8x64xf32> -> vector<8x64xf32>
    %c0_9 = arith.constant 0 : index
    %c0_10 = arith.constant 0 : index
    %10 = vector.load %arg5[%c0_9, %c0_10] : memref<1x64xf32, #tpu.memory_space<vmem>>, vector<1x64xf32>
    %11 = vector.broadcast %10 : vector<1x64xf32> to vector<8x64xf32>
    %12 = arith.addf %9, %11 : vector<8x64xf32>
    %cst_11 = arith.constant 0.000000e+00 : f32
    %13 = vector.broadcast %cst_11 : f32 to vector<8x64xf32>
    %14 = arith.maximumf %12, %13 : vector<8x64xf32>
    %c0_12 = arith.constant 0 : index
    %c0_13 = arith.constant 0 : index
    %15 = vector.load %arg6[%c0_12, %c0_13] : memref<64x64xf32, #tpu.memory_space<vmem>>, vector<64x64xf32>
    %cst_14 = arith.constant dense<0.000000e+00> : vector<8x64xf32>
    %16 = tpu.matmul %14, %15, %cst_14 {dimension_numbers = #tpu.dot_dimension_numbers<[1], [0], [0], [1], [0, 0, 1, 1], [], []>} : vector<8x64xf32>, vector<64x64xf32>, vector<8x64xf32> -> vector<8x64xf32>
    %c0_15 = arith.constant 0 : index
    %c0_16 = arith.constant 0 : index
    %17 = vector.load %arg7[%c0_15, %c0_16] : memref<1x64xf32, #tpu.memory_space<vmem>>, vector<1x64xf32>
    %18 = vector.broadcast %17 : vector<1x64xf32> to vector<8x64xf32>
    %19 = arith.addf %16, %18 : vector<8x64xf32>
    %cst_17 = arith.constant 0.000000e+00 : f32
    %20 = vector.broadcast %cst_17 : f32 to vector<8x64xf32>
    %21 = arith.maximumf %19, %20 : vector<8x64xf32>
    %c0_18 = arith.constant 0 : index
    %c0_19 = arith.constant 0 : index
    %22 = vector.load %arg8[%c0_18, %c0_19] : memref<64x128xf32, #tpu.memory_space<vmem>>, vector<64x128xf32>
    %cst_20 = arith.constant dense<0.000000e+00> : vector<8x128xf32>
    %23 = tpu.matmul %21, %22, %cst_20 {dimension_numbers = #tpu.dot_dimension_numbers<[1], [0], [0], [1], [0, 0, 1, 1], [], []>} : vector<8x64xf32>, vector<64x128xf32>, vector<8x128xf32> -> vector<8x128xf32>
    %c0_21 = arith.constant 0 : index
    %c0_22 = arith.constant 0 : index
    %24 = vector.load %arg9[%c0_21, %c0_22] : memref<1x128xf32, #tpu.memory_space<vmem>>, vector<1x128xf32>
    %25 = vector.broadcast %24 : vector<1x128xf32> to vector<8x128xf32>
    %26 = arith.addf %23, %25 : vector<8x128xf32>
    %27 = vector.extract_strided_slice %26 {offsets = [0, 4], sizes = [8, 1], strides = [1, 1]} : vector<8x128xf32> to vector<8x1xf32>
    %28 = vector.extract_strided_slice %26 {offsets = [0, 5], sizes = [8, 1], strides = [1, 1]} : vector<8x128xf32> to vector<8x1xf32>
    %29 = vector.broadcast %27 : vector<8x1xf32> to vector<8x128xf32>
    %30 = arith.addf %26, %29 : vector<8x128xf32>
    %31 = vector.broadcast %28 : vector<8x1xf32> to vector<8x128xf32>
    %32 = arith.subf %30, %31 : vector<8x128xf32>
    %c0_23 = arith.constant 0 : index
    %c0_24 = arith.constant 0 : index
    %33 = vector.load %arg10[%c0_23, %c0_24] : memref<8x128xf32, #tpu.memory_space<vmem>>, vector<8x128xf32>
    tpu.vector_store %arg10[%c0_23, %c0_24], %32 {strides = array<i32>} : memref<8x128xf32, #tpu.memory_space<vmem>>, vector<8x128xf32>,
    return
  }
  func.func @transform_0(%arg0: i32) -> (i32, i32) {
    %c0_i32 = arith.constant 0 : i32
    %c0_i32_0 = arith.constant 0 : i32
    return %arg0, %c0_i32 : i32, i32
  }
  func.func @transform_1(%arg0: i32) -> (i32, i32) {
    %c0_i32 = arith.constant 0 : i32
    %c0_i32_0 = arith.constant 0 : i32
    %c0_i32_1 = arith.constant 0 : i32
    return %c0_i32, %c0_i32_0 : i32, i32
  }
  func.func @transform_2(%arg0: i32) -> (i32, i32) {
    %c0_i32 = arith.constant 0 : i32
    %c0_i32_0 = arith.constant 0 : i32
    %c0_i32_1 = arith.constant 0 : i32
    return %c0_i32, %c0_i32_0 : i32, i32
  }
  func.func @transform_3(%arg0: i32) -> (i32, i32) {
    %c0_i32 = arith.constant 0 : i32
    %c0_i32_0 = arith.constant 0 : i32
    %c0_i32_1 = arith.constant 0 : i32
    return %c0_i32, %c0_i32_0 : i32, i32
  }
  func.func @transform_4(%arg0: i32) -> (i32, i32) {
    %c0_i32 = arith.constant 0 : i32
    %c0_i32_0 = arith.constant 0 : i32
    %c0_i32_1 = arith.constant 0 : i32
    return %c0_i32, %c0_i32_0 : i32, i32
  }
  func.func @transform_5(%arg0: i32) -> (i32, i32) {
    %c0_i32 = arith.constant 0 : i32
    %c0_i32_0 = arith.constant 0 : i32
    %c0_i32_1 = arith.constant 0 : i32
    return %c0_i32, %c0_i32_0 : i32, i32
  }
  func.func @transform_6(%arg0: i32) -> (i32, i32) {
    %c0_i32 = arith.constant 0 : i32
    %c0_i32_0 = arith.constant 0 : i32
    %c0_i32_1 = arith.constant 0 : i32
    return %c0_i32, %c0_i32_0 : i32, i32
  }
  func.func @transform_7(%arg0: i32) -> (i32, i32) {
    %c0_i32 = arith.constant 0 : i32
    %c0_i32_0 = arith.constant 0 : i32
    %c0_i32_1 = arith.constant 0 : i32
    return %c0_i32, %c0_i32_0 : i32, i32
  }
  func.func @transform_8(%arg0: i32) -> (i32, i32) {
    %c0_i32 = arith.constant 0 : i32
    %c0_i32_0 = arith.constant 0 : i32
    %c0_i32_1 = arith.constant 0 : i32
    return %c0_i32, %c0_i32_0 : i32, i32
  }
  func.func @transform_9(%arg0: i32) -> (i32, i32) {
    %c0_i32 = arith.constant 0 : i32
    %c0_i32_0 = arith.constant 0 : i32
    return %arg0, %c0_i32 : i32, i32
  }
}

</mosaic_0001>

<bundles_post_ra>
// kernel: tpu_custom_call.1
= control target key start
LH: loop header
LB: loop body
LE: loop exit
PB: predicated region body
PF: predicated region fallthrough
CT: control target
= control target key end

     0   :  { %v624_v2 = vmov 0.0|0.0   ;;  %vm625_vm0 = vmmov 0   ;;  %v626_v4 = vmov 0.0   ;;  %vm43_vm1 = vcmask 130048   ;;  %s836_s0 = inlined_call_operand.vmem [shape: f32[8,16], index: 0, kind: input, shape index: {}]   ;;  %s837_s1 = inlined_call_operand.vmem [shape: f32[16,128], index: 1, kind: input, shape index: {}]   ;;  %s838_s2 = inlined_call_operand.vmem [shape: f32[1,128], index: 2, kind: input, shape index: {}]   ;;  %s839_s3 = inlined_call_operand.vmem [shape: f32[128,64], index: 3, kind: input, shape index: {}]   ;;  %s840_s4 = inlined_call_operand.vmem [shape: f32[1,64], index: 4, kind: input, shape index: {}]   ;;  %s841_s5 = inlined_call_operand.vmem [shape: f32[64,64], index: 5, kind: input, shape index: {}]   ;;  %s842_s6 = inlined_call_operand.vmem [shape: f32[1,64], index: 6, kind: input, shape index: {}]   ;;  %s843_s7 = inlined_call_operand.vmem [shape: f32[64,128], index: 7, kind: input, shape index: {}]   ;;  %s844_s8 = inlined_call_operand.vmem [shape: f32[1,128], index: 8, kind: input, shape index: {}]   ;;  %s845_s9 = inlined_call_operand.hbm [shape: f32[8,128], index: 9, kind: output, shape index: {}]  }
   0x1   :  { %v34_v0 = vld [vmem:[%s837_s1] sm:$0xff]  ;;  %v35_v1 = vld [vmem:[%s837_s1 + $0x8] sm:$0xff]  ;;  %541 = vmatprep.subr.bf16.mxu0 %v624_v2  ;;  %465 = vmatprep.mubr.msk.f32.mxu0 %vm625_vm0, %v626_v4  ;;  %v120_v7 = vld [vmem:[%s839_s3 + $0x10] sm:$0xff] }
   0x2   :  { %v542_v3 = vpack.c.bf16 %v35_v1, %v34_v0  ;;  %v118_v5 = vld [vmem:[%s839_s3] sm:$0xff]  ;;  %v119_v6 = vld [vmem:[%s839_s3 + $0x8] sm:$0xff]  ;;  %544 = vmatprep.subr.bf16.mxu1 %v624_v2  ;;  %v121_v9 = vld [vmem:[%s839_s3 + $0x18] sm:$0xff]  ;;  %500 = vmatprep.mubr.msk.f32.mxu1 %vm625_vm0, %v626_v4 }
   0x3   :  { %v545_v8 = vpack.c.bf16 %v119_v6, %v118_v5  ;;  %v33_v10 = vld [vmem:[%s836_s0] sm:$0xff]  ;;  %v548_v11 = vpack.c.bf16 %v121_v9, %v120_v7  ;;  %v123_v13 = vld [vmem:[%s839_s3 + $0x28] sm:$0xff] }
   0x4   :  { %543 = vmatpush3.bf16.msra.mxu0 %v542_v3  ;;  %v122_v12 = vld [vmem:[%s839_s3 + $0x20] sm:$0xff] }
   0x5   :  { %546 = vmatpush3.bf16.msra.mxu1 %v545_v8  ;;  %568 = vmatprep.subr.bf16.mxu0 %v624_v2 }
   0x6   :  { %547 = vmatprep.subr.bf16.mxu1 %v624_v2 }
   0x7   :  { %466 = vmatmul.mubr.msk.f32.vlgmr.msra.gmra.mrb[0].mxu0 %vm43_vm1, %v33_v10 }
   0x8   :  { %14 = vsyncpa [#allocation3], 0  ;;  %519 = vmatprep.mubr.msk.f32.mxu0 %vm625_vm0, %v626_v4  ;;  %v551_v14 = vpack.c.bf16 %v123_v13, %v122_v12  ;;  %v124_v15 = vld [vmem:[%s839_s3 + $0x30] sm:$0xff]  ;;  %v125_v16 = vld [vmem:[%s839_s3 + $0x38] sm:$0xff]  ;;  %vm227_vm2 = vcmask 523264   ;;  %v628_v10 = vmov 5  }
   0x9   :  { %549 = vmatpush3.bf16.msra.mxu1 %v548_v11  ;;  %v554_v17 = vpack.c.bf16 %v125_v16, %v124_v15  ;;  %v126_v18 = vld [vmem:[%s839_s3 + $0x40] sm:$0xff]  ;;  %v127_v19 = vld [vmem:[%s839_s3 + $0x48] sm:$0xff]  ;;  %v128_v21 = vld [vmem:[%s839_s3 + $0x50] sm:$0xff] }
   0xa   :  { %550 = vmatprep.subr.bf16.mxu1 %v624_v2  ;;  %v557_v20 = vpack.c.bf16 %v127_v19, %v126_v18  ;;  %v129_v22 = vld [vmem:[%s839_s3 + $0x58] sm:$0xff]  ;;  %v130_v24 = vld [vmem:[%s839_s3 + $0x60] sm:$0xff]  ;;  %v131_v25 = vld [vmem:[%s839_s3 + $0x68] sm:$0xff] }
   0xb   :  { %v560_v23 = vpack.c.bf16 %v129_v22, %v128_v21  ;;  %v563_v26 = vpack.c.bf16 %v131_v25, %v130_v24  ;;  %v132_v27 = vld [vmem:[%s839_s3 + $0x70] sm:$0xff]  ;;  %v133_v28 = vld [vmem:[%s839_s3 + $0x78] sm:$0xff]  ;;  %v212_v30 = vld [vmem:[%s841_s5] sm:$0xff] }
   0xc   :  { %v566_v29 = vpack.c.bf16 %v133_v28, %v132_v27  ;;  %v213_v31 = vld [vmem:[%s841_s5 + $0x8] sm:$0xff]  ;;  %v214_v32 = vld [vmem:[%s841_s5 + $0x10] sm:$0xff]  ;;  %v215_v34 = vld [vmem:[%s841_s5 + $0x18] sm:$0xff] }
   0xd   :  { %552 = vmatpush3.bf16.msra.mxu1 %v551_v14  ;;  %v569_v33 = vpack.c.bf16 %v213_v31, %v212_v30  ;;  %v572_v35 = vpack.c.bf16 %v215_v34, %v214_v32  ;;  %v216_v36 = vld [vmem:[%s841_s5 + $0x20] sm:$0xff]  ;;  %v217_v37 = vld [vmem:[%s841_s5 + $0x28] sm:$0xff]  ;;  %v218_v44 = vld [vmem:[%s841_s5 + $0x30] sm:$0xff] }
   0xe   :  { %553 = vmatprep.subr.bf16.mxu1 %v624_v2  ;;  %v575_v38 = vpack.c.bf16 %v217_v37, %v216_v36  ;;  %v416_v39 = vld [vmem:[%s838_s2] ss:$0 sm:$0xff]  ;;  %v219_v45 = vld [vmem:[%s841_s5 + $0x38] sm:$0xff]  ;;  %v303_v49 = vld [vmem:[%s843_s7 + $0x8] sm:$0xff] }
   0xf   :  { %570 = vmatpush3.bf16.msra.mxu0 %v569_v33  ;;  %v578_v46 = vpack.c.bf16 %v219_v45, %v218_v44  ;;  %v418_v47 = vld [vmem:[%s840_s4] ss:$0 sm:$0xff]  ;;  %v304_v55 = vld [vmem:[%s843_s7 + $0x10] sm:$0xff]  ;;  %v305_v56 = vld [vmem:[%s843_s7 + $0x18] sm:$0xff] }
  0x10   :  { %571 = vmatprep.subr.bf16.mxu0 %v624_v2  ;;  %v302_v48 = vld [vmem:[%s843_s7] sm:$0xff]  ;;  %v584_v57 = vpack.c.bf16 %v305_v56, %v304_v55  ;;  %v307_v59 = vld [vmem:[%s843_s7 + $0x28] sm:$0xff]  ;;  %v308_v61 = vld [vmem:[%s843_s7 + $0x30] sm:$0xff] }
  0x11   :  { %555 = vmatpush3.bf16.msra.mxu1 %v554_v17  ;;  %v581_v53 = vpack.c.bf16 %v303_v49, %v302_v48  ;;  %v306_v58 = vld [vmem:[%s843_s7 + $0x20] sm:$0xff]  ;;  %v309_v62 = vld [vmem:[%s843_s7 + $0x38] sm:$0xff] }
  0x12   :  { %556 = vmatprep.subr.bf16.mxu1 %v624_v2  ;;  %v587_v60 = vpack.c.bf16 %v307_v59, %v306_v58  ;;  %v590_v63 = vpack.c.bf16 %v309_v62, %v308_v61  ;;  %v419_v0 = vld [vmem:[%s842_s6] ss:$0 sm:$0xff]  ;;  %s629_s6 = smov [#allocation2]  }
  0x13   :  { %573 = vmatpush3.bf16.msra.mxu0 %v572_v35  ;;  %v421_v6 = vld [vmem:[%s844_s8] ss:$0 sm:$0xff]  ;;  %s408_s7 = sshll.u32 %s629_s6, 4  ;;  %s409_s7 = int_to_ptr.vmem [resolvable:$true] %s408_s7 }
  0x14   :  { %574 = vmatprep.subr.bf16.mxu0 %v624_v2  ;;  %s600_s13 = scalar_lea.vmem %s409_s7, 128  ;;  %p605_p1 = scmp.lt.s32.totalorder %s409_s7, %s409_s7 }
  0x15   :  { %558 = vmatpush3.bf16.msra.mxu1 %v557_v20  ;;  %p601_p0 = scmp.ne.s32.totalorder %s409_s7, %s600_s13  ;;  %p606_p2 = scmp.lt.s32.totalorder %s600_s13, %s600_s13 }
  0x16   :  { %559 = vmatprep.subr.bf16.mxu1 %v624_v2 }
  0x17   :  { %576 = vmatpush3.bf16.msra.mxu0 %v575_v38  ;;  %p607_p3 = por %p606_p2, %p605_p1 }
  0x18   :  { %577 = vmatprep.subr.bf16.mxu0 %v624_v2 }
  0x19   :  { %561 = vmatpush3.bf16.msra.mxu1 %v560_v23  ;;  %p608_p4 = pnand %p607_p3, %p601_p0 }
  0x1a   :  { %562 = vmatprep.subr.bf16.mxu1 %v624_v2 }
  0x1b   :  { %579 = vmatpush3.bf16.msra.mxu0 %v578_v46 }
  0x1c   :  { %580 = vmatprep.subr.bf16.mxu0 %v624_v2 }
  0x1d   :  { %564 = vmatpush3.bf16.msra.mxu1 %v563_v26 }
  0x1e   :  { %565 = vmatprep.subr.bf16.mxu1 %v624_v2 }
  0x21   :  { %567 = vmatpush3.bf16.msra.mxu1 %v566_v29 }
  0xda   :  { %v113_v40 = vpop.f32.mrb[0].mxu0 }
  0xdb   :  { %v114_v41 = vadd.f32 %v416_v39, %v113_v40  ;;  %v467_v42 = vpop.f32.mrb[1].mxu0 }
  0xdd   :  { %v117_v43 = vmax.f32 %v114_v41, 0.0 }
  0xdf   :  { %501 = vmatmul.mubr.f32.vlgmr.msra.gmra.mrb[0].mxu1 %v117_v43 }
 0x1b2   :  { %v207_v50 = vpop.f32.mrb[0].mxu1 }
 0x1b3   :  { %v208_v51 = vadd.f32 %v418_v47, %v207_v50  ;;  %v502_v52 = vpop.f32.mrb[1].mxu1 }
 0x1b5   :  { %v211_v54 = vmax.f32 %v208_v51, 0.0 }
 0x1b7   :  { %520 = vmatmul.mubr.msk.f32.vlgmr.msra.gmra.mrb[2].mxu0 %vm227_vm2, %v211_v54 }
 0x1b8   :  { %582 = vmatpush3.bf16.msra.mxu0 %v581_v53  ;;  %538 = vmatprep.mubr.msk.f32.mxu0 %vm625_vm0, %v626_v4 }
 0x1b9   :  { %583 = vmatprep.subr.bf16.mxu0 %v624_v2 }
 0x1bc   :  { %585 = vmatpush3.bf16.msra.mxu0 %v584_v57 }
 0x1bd   :  { %586 = vmatprep.subr.bf16.mxu0 %v624_v2 }
 0x1c0   :  { %588 = vmatpush3.bf16.msra.mxu0 %v587_v60 }
 0x1c1   :  { %589 = vmatprep.subr.bf16.mxu0 %v624_v2  ;;  %v627_v2 = vmov 4  }
 0x1c2   :  { %598 = vset.pattern.permute.xlu0 %v627_v2 }
 0x1c4   :  { %591 = vmatpush3.bf16.msra.mxu0 %v590_v63 }
 0x28a   :  { %v297_v1 = vpop.f32.mrb[2].mxu0 }
 0x28b   :  { %v298_v3 = vadd.f32 %v419_v0, %v297_v1  ;;  %v521_v4 = vpop.f32.mrb[3].mxu0 }
 0x28d   :  { %v301_v5 = vmax.f32 %v298_v3, 0.0 }
 0x28f   :  { %539 = vmatmul.mubr.msk.f32.vlgmr.msra.gmra.mrb[4].mxu0 %vm227_vm2, %v301_v5 }
 0x362   :  { %v386_v7 = vpop.f32.mrb[4].mxu0 }
 0x363   :  { %v387_v8 = vadd.f32 %v421_v6, %v386_v7  ;;  %v540_v9 = vpop.f32.mrb[5].mxu0 }
 0x365   :  { %392 = vperm.xlu0 %598, %v387_v8  }
 0x369   :  { %599 = vset.pattern.permute.xlu0 %v628_v10 }
 0x36a   :  { %397 = vperm.xlu0 %599, %v387_v8  }
 0x3e4   :  { %v393_v11 = vpop.permute.xlu0 %392 }
 0x3e5   :  { %v395_v12 = vadd.f32 %v393_v11, %v387_v8 }
 0x3e9   :  { %v398_v13 = vpop.permute.xlu0 %397 }
 0x3ea   :  { %v400_v14 = vsub.f32 %v395_v12, %v398_v13 }
 0x3ec   :  { %401 = vst [vmem:[#allocation2] sm:$0xff] %v400_v14 }
 0x3ed   :  { %611 = shalt.err (!%p608_p4)
}
 0x3ee   :  { %s612_s15 = scalar_lea.hbm %s845_s9, 128 }
 0x3ef   :  { %p613_p5 = scmp.ne.s32.totalorder %s845_s9, %s612_s15  ;;  %p616_p6 = scmp.lt.u32.totalorder %s612_s15, %s845_s9 }
 0x3f1   :  { %p618_p7 = pnand %p616_p6, %p613_p5 }
 0x3f3   :  { %621 = shalt.err (!%p618_p7)
}
 0x3f4   :  { %411 = dma.vmem_to_hbm [thread:$0]  %s409_s7, 128, %s845_s9, [#allocation3]  }
 0x3f5   :  { %622 = dma.done.wait [#allocation3], 128  }
 0x3f6   :  { %623 = vsyncadd [#allocation3], 4294967168 }
 0x3f7   :  { %415 = vsyncpa [#allocation3], 1 }

</bundles_post_ra>
